<compile_context>
chip_gen: v5e
topology: v5e:2x2
jax: 0.10.0
libtpu: 0.0.40
codegen_flags: <defaults>
</compile_context>

<pallas_src>
import math
import jax
import jax.numpy as jnp
from jax.experimental import pallas as pl
from jax.experimental.pallas import tpu as pltpu


def make_pe(channel: int, joint_num: int, time_len: int, domain: str) -> jnp.ndarray:
    """Builds the positional-encoding buffer, shape (channel, time_len, joint_num)."""
    if domain == "temporal":
        pos = jnp.repeat(jnp.arange(time_len, dtype=jnp.float32), joint_num)
    elif domain == "spatial":
        pos = jnp.tile(jnp.arange(joint_num, dtype=jnp.float32), time_len)
    else:
        raise ValueError(f"unknown domain {domain!r}")

    position = pos[:, None]  # (T*V, 1)
    div_term = jnp.exp(
        jnp.arange(0, channel, 2, dtype=jnp.float32) * -(math.log(10000.0) / channel)
    )  # (channel//2,)

    pe = jnp.zeros((time_len * joint_num, channel), dtype=jnp.float32)
    pe = pe.at[:, 0::2].set(jnp.sin(position * div_term))
    pe = pe.at[:, 1::2].set(jnp.cos(position * div_term))
    # (T*V, C) -> (T, V, C) -> (C, T, V)
    pe = pe.reshape(time_len, joint_num, channel).transpose(2, 0, 1)
    return pe


def _add_pe_kernel(x_ref, pe_ref, o_ref):
    # x_ref / o_ref: (BN, BC, T*V) ; pe_ref: (BC, T*V) shared across the batch
    # block. The broadcast is along the leading (non-lane/sublane) axis, so
    # the body is still plain full-vreg VPU adds with the pe vregs reused.
    o_ref[...] = x_ref[...] + pe_ref[...]


def _pick_blocks(N: int, C: int, L: int, itemsize: int,
                 target_bytes: int = 2 * 1024 * 1024) -> tuple[int, int]:
    """Pick (BN, BC): BC = largest multiple-of-8 divisor of C whose (BC, L)
    slab fits the VMEM target (falls back to C when C has no such divisor,
    which the (8,128) rule then requires); BN = largest divisor of N keeping
    (BN, BC, L) within the target."""
    c_divs = [d for d in range(8, C + 1, 8) if C % d == 0]
    if not c_divs:
        c_divs = [C]
    fitting = [d for d in c_divs if d * L * itemsize <= target_bytes]
    bc = max(fitting) if fitting else min(c_divs)

    bn = 1
    for d in range(1, N + 1):
        if N % d == 0 and d * bc * L * itemsize <= target_bytes:
            bn = d
    return bn, bc


def positional_encoding_forward(x: jnp.ndarray, pe: jnp.ndarray) -> jnp.ndarray:
    """x: (N, C, T, V) ; pe: (C, time_len, V) with time_len >= T."""
    N, C, T, V = x.shape
    Cp, TL, Vp = pe.shape
    assert Cp == C and Vp == V and T <= TL

    L = T * V  # lane-dense flattened axis
    # Contiguous reshape -> free metadata op, no HBM pass.
    x3 = x.reshape(N, C, L)

    # Express the :T slice via the pe BlockSpec (first L flattened columns)
    # whenever the resulting block is (8,128)-legal; otherwise fall back.
    if T == TL:
        pe2 = pe.reshape(C, L)
    elif L % 128 == 0:
        pe2 = pe.reshape(C, TL * V)  # column-block 0 of width L == pe[:, :T, :]
    else:
        # TODO(synk): :T slice not expressible as a legal lane-aligned block
        # here; accept one small extra HBM pass over pe (C*T*V elements, 1/N
        # of the x traffic).
        pe2 = pe[:, :T, :].reshape(C, L)

    # Cast once in the wrapper (e.g. f32 pe -> bf16 activations).
    if pe2.dtype != x.dtype:
        pe2 = pe2.astype(x.dtype)

    BN, BC = _pick_blocks(N, C, L, jnp.dtype(x.dtype).itemsize)
    # Channel blocks on the OUTER axis, batch blocks INNER: pe's block index
    # is constant across consecutive inner steps -> its DMA is elided and pe
    # is fetched from HBM only once per channel block.
    grid = (C // BC, N // BN)

    out3 = pl.pallas_call(
        _add_pe_kernel,
        out_shape=jax.ShapeDtypeStruct((N, C, L), x.dtype),
        grid_spec=pltpu.PrefetchScalarGridSpec(
            num_scalar_prefetch=0,
            grid=grid,
            in_specs=[
                # x: (BN, BC, L) block, moves every step
                pl.BlockSpec((BN, BC, L), lambda c, n: (n, c, 0)),
                # pe: shared across batch; index depends only on the outer axis
                pl.BlockSpec((BC, L), lambda c, n: (c, 0)),
            ],
            out_specs=pl.BlockSpec((BN, BC, L), lambda c, n: (n, c, 0)),
        ),
        compiler_params=pltpu.CompilerParams(
            dimension_semantics=("parallel", "parallel"),
        ),
    )(x3, pe2)

    return out3.reshape(N, C, T, V)


if __name__ == "__main__":
    # Module config (deterministic, in-script)
    channel, joint_num, time_len, domain = 4, 16, 16, "spatial"
    pe = make_pe(channel, joint_num, time_len, domain)  # (4, 16, 16)

    # Input x: (N, C, T, V) with T < time_len to exercise the :T slice path.
    key = jax.random.PRNGKey(0)
    N, T = 2, 8
    x = jax.random.normal(key, (N, channel, T, joint_num), dtype=jnp.float32)

    out = positional_encoding_forward(x, pe)
    out = jax.block_until_ready(out)

    # Reference check against plain JAX broadcast add
    ref = x + pe[None, :, :T, :]
    assert out.shape == x.shape
    assert jnp.allclose(out, ref, atol=1e-6), "mismatch vs reference"

    print("KERNEL_OK")
</pallas_src>

<mosaic_0001>
module attributes {stable_mosaic.version = 11 : i64} {
  func.func @_add_pe_kernel(%arg0: i32, %arg1: i32, %arg2: memref<2x4x128xf32, #tpu.memory_space<vmem>>, %arg3: memref<4x128xf32, #tpu.memory_space<vmem>>, %arg4: memref<2x4x128xf32, #tpu.memory_space<vmem>>) attributes {dimension_semantics = [#tpu.dimension_semantics<parallel>, #tpu.dimension_semantics<parallel>], iteration_bounds = array<i64: 1, 1>, scalar_prefetch = 0 : i64, scratch_operands = 0 : i64, tpu.core_type = #tpu.core_type<tc>, window_params = [{transform_indices = @transform_0, window_bounds = array<i64: 2, 4, 128>}, {transform_indices = @transform_1, window_bounds = array<i64: 4, 128>}, {transform_indices = @transform_2, window_bounds = array<i64: 2, 4, 128>}]} {
    %c0 = arith.constant 0 : index
    %c0_0 = arith.constant 0 : index
    %c0_1 = arith.constant 0 : index
    %0 = vector.load %arg2[%c0, %c0_0, %c0_1] : memref<2x4x128xf32, #tpu.memory_space<vmem>>, vector<2x4x128xf32>
    %c0_2 = arith.constant 0 : index
    %c0_3 = arith.constant 0 : index
    %1 = vector.load %arg3[%c0_2, %c0_3] : memref<4x128xf32, #tpu.memory_space<vmem>>, vector<4x128xf32>
    %2 = vector.shape_cast %1 : vector<4x128xf32> to vector<1x4x128xf32>
    %3 = vector.broadcast %2 : vector<1x4x128xf32> to vector<2x4x128xf32>
    %4 = arith.addf %0, %3 : vector<2x4x128xf32>
    %c0_4 = arith.constant 0 : index
    %c0_5 = arith.constant 0 : index
    %c0_6 = arith.constant 0 : index
    %5 = vector.load %arg4[%c0_4, %c0_5, %c0_6] : memref<2x4x128xf32, #tpu.memory_space<vmem>>, vector<2x4x128xf32>
    tpu.vector_store %arg4[%c0_4, %c0_5, %c0_6], %4 {strides = array<i32>} : memref<2x4x128xf32, #tpu.memory_space<vmem>>, vector<2x4x128xf32>,
    return
  }
  func.func @transform_0(%arg0: i32, %arg1: i32) -> (i32, i32, i32) {
    %c0_i32 = arith.constant 0 : i32
    %c0_i32_0 = arith.constant 0 : i32
    return %arg1, %arg0, %c0_i32 : i32, i32, i32
  }
  func.func @transform_1(%arg0: i32, %arg1: i32) -> (i32, i32) {
    %c0_i32 = arith.constant 0 : i32
    %c0_i32_0 = arith.constant 0 : i32
    return %arg0, %c0_i32 : i32, i32
  }
  func.func @transform_2(%arg0: i32, %arg1: i32) -> (i32, i32, i32) {
    %c0_i32 = arith.constant 0 : i32
    %c0_i32_0 = arith.constant 0 : i32
    return %arg1, %arg0, %c0_i32 : i32, i32, i32
  }
}

</mosaic_0001>

<bundles_post_ra>
// kernel: tpu_custom_call.1
= control target key start
LH: loop header
LB: loop body
LE: loop exit
PB: predicated region body
PF: predicated region fallthrough
CT: control target
= control target key end

     0   :  { %7 = vsyncpa [#allocation3], 0  ;;  %s181_s0 = inlined_call_operand.hbm [shape: f32[2,4,128], index: 0, kind: input, shape index: {}]   ;;  %s182_s1 = inlined_call_operand.hbm [shape: f32[4,256], index: 1, kind: input, shape index: {}]   ;;  %s183_s2 = inlined_call_operand.hbm [shape: f32[2,4,128], index: 2, kind: output, shape index: {}]  }
   0x1   :  { %8 = vsyncpa [#allocation6], 0 }
   0x2   :  { %9 = vsyncpa [#allocation4], 0  ;;  %s14_s11 = sshll.u32 %s181_s0, 4  ;;  %s152_s12 = smov [#allocation2]   ;;  %s15_s11 = int_to_ptr.hbm [resolvable:$true] %s14_s11 }
   0x3   :  { %s16_s13 = sshll.u32 %s152_s12, 4  ;;  %s28_s16 = sshll.u32 %s182_s1, 4  ;;  %s17_s13 = int_to_ptr.vmem [resolvable:$true] %s16_s13  ;;  %s29_s16 = int_to_ptr.hbm [resolvable:$true] %s28_s16 }
   0x4   :  { %s153_s17 = smov 64   ;;  %s154_s18 = smov 4  }
   0x5   :  { %22 = dma.hbm_to_vmem [thread:$0]  %s15_s11, 128, %s17_s13, [#allocation3], %s153_s17, %s153_s17, %s154_s18  }
   0x6   :  { %s155_s19 = smov [#allocation5]  }
   0x7   :  { %s30_s20 = sshll.u32 %s155_s19, 4  ;;  %s31_s20 = int_to_ptr.vmem [resolvable:$true] %s30_s20 }
   0x8   :  { %33 = dma.hbm_to_vmem [thread:$0]  %s29_s16, 64, %s31_s20, [#allocation6]  }
   0x9   :  { %146 = dma.done.wait [#allocation3], 128  }
   0xa   :  { %147 = vsyncadd [#allocation3], 4294967168 }
   0xb   :  { %148 = dma.done.wait [#allocation6], 64  }
   0xc   :  { %149 = vsyncadd [#allocation6], 4294967232  ;;  %s156_s0 = smov [#allocation7]   ;;  %s55_s24 = sshll.u32 %s183_s2, 4  ;;  %v42_v0 = vld [vmem:[#allocation2] sm:$0xf]  ;;  %s56_s24 = int_to_ptr.hbm [resolvable:$true] %s55_s24 }
   0xd   :  { %s53_s21 = sshll.u32 %s156_s0, 4  ;;  %v44_v1 = vld [vmem:[#allocation5] sm:$0xf]  ;;  %v43_v2 = vld [vmem:[#allocation2 + $0x4] sm:$0xf]  ;;  %s54_s21 = int_to_ptr.vmem [resolvable:$true] %s53_s21 }
   0xe   :  { %v45_v3 = vadd.f32 %v44_v1, %v42_v0  ;;  %v46_v4 = vadd.f32 %v44_v1, %v43_v2 }
  0x10   :  { %47 = vst [vmem:[#allocation7] sm:$0xf] %v45_v3 }
  0x11   :  { %48 = vst [vmem:[#allocation7 + $0x4] sm:$0xf] %v46_v4 }
  0x12   :  { %61 = dma.vmem_to_hbm [thread:$0]  %s54_s21, 128, %s56_s24, [#allocation4], %s153_s17, %s153_s17, %s154_s18  }
  0x13   :  { %150 = dma.done.wait [#allocation4], 128  }
  0x14   :  { %151 = vsyncadd [#allocation4], 4294967168 }
  0x15   :  { %66 = vsyncpa [#allocation3], 1 }
  0x16   :  { %67 = vsyncpa [#allocation6], 1 }
  0x17   :  { %68 = vsyncpa [#allocation4], 1 }

</bundles_post_ra>
